<compile_context>
chip_gen: v7x
topology: tpu7x:2x2x1
jax: 0.10.0
libtpu: 0.0.40
codegen_flags: <defaults>
</compile_context>

<pallas_src>
import jax
import jax.numpy as jnp
from jax.experimental import pallas as pl
from jax.experimental.pallas import tpu as pltpu

NEURON = 100  # self.neuron_num

# ---- slab row layout (one (16,128) f32 operand carries every small tensor) ----
ROW_X9 = 0    # x[0,0:9]                                            lanes 0:9
ROW_G  = 1    # rows 1..3: G = x9.reshape(3,3)/0.05, diag zeroed    lanes 0:3
ROW_GT = 4    # rows 4..6: G.T                                      lanes 0:3
ROW_WT = 7    # w.T  = x[0,9:12]                                    lanes 0:3
ROW_PT = 8    # p.T  = x[0,15:18]                                   lanes 0:3
ROW_B1 = 9    # bias Linear(9,100)   (alpha path)                   lanes 0:100
ROW_B2 = 10   # bias Linear(100,9)   (alpha path)                   lanes 0:9
ROW_B3 = 11   # bias Linear(9,100)   (m path)                       lanes 0:100
ROW_B4 = 12   # bias Linear(100,100) (m path)                       lanes 0:100
ROW_B5 = 13   # bias Linear(100,3)   (m path)                       lanes 0:3

# w13 block-stack layout: blocks 0..2 = W1 rows [0:3],[3:6],[6:9]; blocks 3..5 = W3 likewise.
W1_BLK = 0
W3_BLK = 3

# w245 lane layout: [ W4 : 0..99 | W2 : 100..108 | W5 : 109..111 ]
W4_LO, W4_HI = 0, 100
W2_LO, W2_HI = 100, 109
W5_LO, W5_HI = 109, 112


def cvxnn_kernel(slab_ref, w13_ref, w245_ref, m_ref):
    f32 = jnp.float32

    x9 = slab_ref[ROW_X9:ROW_X9 + 1, 0:9]        # (1, 9)
    G  = slab_ref[ROW_G:ROW_G + 3, 0:3]          # (3, 3)  pre-scaled, zero diagonal
    GT = slab_ref[ROW_GT:ROW_GT + 3, 0:3]        # (3, 3)
    wT = slab_ref[ROW_WT:ROW_WT + 1, 0:3]        # (1, 3)
    pT = slab_ref[ROW_PT:ROW_PT + 1, 0:3]        # (1, 3)
    b1 = slab_ref[ROW_B1:ROW_B1 + 1, 0:100]      # (1, 100)
    b2 = slab_ref[ROW_B2:ROW_B2 + 1, 0:9]        # (1, 9)
    b3 = slab_ref[ROW_B3:ROW_B3 + 1, 0:100]      # (1, 100)
    b4 = slab_ref[ROW_B4:ROW_B4 + 1, 0:100]      # (1, 100)
    b5 = slab_ref[ROW_B5:ROW_B5 + 1, 0:3]        # (1, 3)

    w245 = w245_ref[...]                         # (100, 112) = [W4 | W2 | W5]

    # alpha = relu(Linear(9,100)(x9)); alpha = relu(Linear(100,9)(alpha))
    # x9 @ W1 as three (1,3)x(3,100) block matmuls so every W1 slice lives inside one
    # (8,128) sublane tile (W1 ships inside the same block stack as W3: one DMA fewer).
    a1 = jnp.maximum(
        jnp.dot(x9[:, 0:3], w13_ref[W1_BLK + 0], preferred_element_type=f32)
        + jnp.dot(x9[:, 3:6], w13_ref[W1_BLK + 1], preferred_element_type=f32)
        + jnp.dot(x9[:, 6:9], w13_ref[W1_BLK + 2], preferred_element_type=f32)
        + b1, 0.0)                                                           # (1, 100)
    t  = jnp.dot(a1, w245, preferred_element_type=f32)                        # (1, 112)
    a2 = jnp.maximum(t[:, W2_LO:W2_HI] + b2, 0.0)   # (1,9) == a1 @ W2 + b2 == flattened alpha

    # h.T = (G @ p + 1).T = p.T @ G.T + 1 ;  (w.T @ G) ;  (w.T @ alpha.reshape(3,3))
    hT = jnp.dot(pT, GT, preferred_element_type=f32) + 1.0      # (1, 3)
    wG = jnp.dot(wT, G, preferred_element_type=f32)             # (1, 3)
    # wA[j] = sum_i w[i] * alpha33[i, j]; tiny lane extracts + VPU FMAs, no MXU needed.
    wA = (wT[:, 0:1] * a2[:, 0:3]
          + wT[:, 1:2] * a2[:, 3:6]
          + wT[:, 2:3] * a2[:, 6:9])                            # (1, 3)

    # hw.T @ W3 == hT @ W3[0:3] + wG @ W3[3:6] + wA @ W3[6:9];  W3 is pre-split host-side into
    # (3,100) blocks of the same stack so each block sits in its own (8,128) tile.
    m1 = (jnp.dot(hT, w13_ref[W3_BLK + 0], preferred_element_type=f32)
          + jnp.dot(wG, w13_ref[W3_BLK + 1], preferred_element_type=f32)
          + jnp.dot(wA, w13_ref[W3_BLK + 2], preferred_element_type=f32)
          + b3)                                                              # (1, 100)
    m2 = jnp.dot(m1, w245, preferred_element_type=f32)[:, W4_LO:W4_HI] + b4  # m1 @ W4 + b4
    m3 = jnp.dot(m2, w245, preferred_element_type=f32)[:, W5_LO:W5_HI] + b5  # m2 @ W5 + b5

    # m is computed but discarded by the reference; emitted as the only kernel output so the
    # matmul hot path is not dead-code eliminated.  The forward() return value (p_bar.T) is a
    # pure input passthrough and is produced by the wrapper (saves one output DMA).
    m_ref[...] = m3


def init_params(key):
    """Deterministic stand-ins for the nn.Linear layers built inside forward()."""
    def linear(k, fan_in, fan_out):
        k1, k2 = jax.random.split(k)
        bound = float(1.0 / (fan_in ** 0.5))
        W = jax.random.uniform(k1, (fan_in, fan_out), jnp.float32, -bound, bound)
        b = jax.random.uniform(k2, (1, fan_out), jnp.float32, -bound, bound)
        return W, b
    ks = jax.random.split(key, 5)
    W1, b1 = linear(ks[0], 9, NEURON)        # alpha: Linear(9, 100)
    W2, b2 = linear(ks[1], NEURON, 9)        # alpha: Linear(100, 9)
    W3, b3 = linear(ks[2], 9, NEURON)        # unrollL: Linear(9, 100)
    W4, b4 = linear(ks[3], NEURON, NEURON)   # unrollL: Linear(100, 100)
    W5, b5 = linear(ks[4], NEURON, 3)        # unrollL: Linear(100, 3)
    return (W1, b1, W2, b2, W3, b3, W4, b4, W5, b5)


def pack_params(params):
    """One-time host-side packing: fewer, fatter, tile-aligned kernel operands."""
    W1, b1, W2, b2, W3, b3, W4, b4, W5, b5 = params
    # Blocks 0..2 = W1 row-blocks, 3..5 = W3 row-blocks: one (6,3,100) operand, one DMA.
    w13 = jnp.stack([W1[0:3], W1[3:6], W1[6:9],
                     W3[0:3], W3[3:6], W3[6:9]], axis=0)        # (6, 3, 100)
    w245 = jnp.concatenate([W4, W2, W5], axis=1)                # (100, 112) = [W4|W2|W5]
    slab = jnp.zeros((16, 128), jnp.float32)
    slab = slab.at[ROW_B1, 0:100].set(b1[0])
    slab = slab.at[ROW_B2, 0:9].set(b2[0])
    slab = slab.at[ROW_B3, 0:100].set(b3[0])
    slab = slab.at[ROW_B4, 0:100].set(b4[0])
    slab = slab.at[ROW_B5, 0:3].set(b5[0])
    return w13, w245, slab


@jax.jit
def cvxnn_forward(x, w13, w245, slab_template):
    # Glue (slicing / reshaping / scaling of the tiny input row) stays in plain JAX and is
    # fused into the slab-prep; the kernel sees one small slab + two weight operands.
    x0 = x[0].astype(jnp.float32)
    x9 = x0[0:9]
    G = x9.reshape(3, 3) / 0.05
    G = G - jnp.diag(jnp.diag(G))            # zero the diagonal (host-side fusion)
    wT = x0[9:12]
    pT = x0[15:18]

    slab = slab_template
    slab = slab.at[ROW_X9, 0:9].set(x9)
    slab = slab.at[ROW_G:ROW_G + 3, 0:3].set(G)
    slab = slab.at[ROW_GT:ROW_GT + 3, 0:3].set(G.T)
    slab = slab.at[ROW_WT, 0:3].set(wT)
    slab = slab.at[ROW_PT, 0:3].set(pT)

    vmem = pl.BlockSpec(memory_space=pltpu.MemorySpace.VMEM)
    m = pl.pallas_call(
        cvxnn_kernel,
        out_shape=jax.ShapeDtypeStruct((1, 3), jnp.float32),
        in_specs=[vmem, vmem, vmem],
        out_specs=vmem,
    )(slab, w13, w245)

    # unrollL returns p_bar unchanged; forward() returns p_bar.T (pure passthrough of x).
    return pT.reshape(1, 3), m


def m_reference(x, params):
    """Pure-JAX reference for the (discarded-in-PyTorch) m path, high precision."""
    hp = jax.lax.Precision.HIGHEST
    W1, b1, W2, b2, W3, b3, W4, b4, W5, b5 = params
    x0 = x[0].astype(jnp.float32)
    x9 = x0[0:9]
    a1 = jax.nn.relu(jnp.dot(x9, W1, precision=hp) + b1[0])
    a2 = jax.nn.relu(jnp.dot(a1, W2, precision=hp) + b2[0])
    alpha33 = a2.reshape(3, 3)
    G = x9.reshape(3, 3) / 0.05
    G = G - jnp.diag(jnp.diag(G))
    w = x0[9:12].reshape(3, 1)
    p = x0[15:18].reshape(3, 1)
    h = jnp.dot(G, p, precision=hp) + 1.0
    hw = jnp.concatenate([h,
                          jnp.dot(w.T, G, precision=hp).T,
                          jnp.dot(w.T, alpha33, precision=hp).T], axis=0)   # (9,1)
    m1 = jnp.dot(hw.T, W3, precision=hp) + b3[0]
    m2 = jnp.dot(m1, W4, precision=hp) + b4[0]
    m3 = jnp.dot(m2, W5, precision=hp) + b5[0]
    return m3.reshape(1, 3)


if __name__ == "__main__":
    key = jax.random.PRNGKey(0)
    kx, kp = jax.random.split(key)
    # small input consistent with the module: batch=2, 18 features (forward uses x[0][0:18])
    x = jax.random.normal(kx, (2, 18), dtype=jnp.float32)
    params = init_params(kp)
    w13, w245, slab_template = pack_params(params)

    out, m = cvxnn_forward(x, w13, w245, slab_template)
    jax.block_until_ready((out, m))

    assert out.shape == (1, 3) and m.shape == (1, 3)
    # forward() returns p_bar.T = x[0, 15:18] as a (1, 3) row (exact passthrough).
    assert jnp.allclose(out, x[0, 15:18].reshape(1, 3), atol=1e-6)
    # sanity-check the kernel's m path against the pure-JAX reference (norm-based, tolerant
    # of MXU vs XLA f32 matmul rounding differences).
    m_ref = m_reference(x, params)
    rel = jnp.linalg.norm(m - m_ref) / (jnp.linalg.norm(m_ref) + 1e-6)
    assert float(rel) < 3e-2, f"m path mismatch: rel_err={float(rel)}"
    print("KERNEL_OK")
</pallas_src>

<mosaic_0001>
module attributes {stable_mosaic.version = 11 : i64} {
  func.func @cvxnn_kernel(%arg0: memref<16x128xf32, #tpu.memory_space<vmem>>, %arg1: memref<6x3x100xf32, #tpu.memory_space<vmem>>, %arg2: memref<100x112xf32, #tpu.memory_space<vmem>>, %arg3: memref<1x3xf32, #tpu.memory_space<vmem>>) attributes {dimension_semantics = [], scalar_prefetch = 0 : i64, scratch_operands = 0 : i64, tpu.core_type = #tpu.core_type<tc>} {
    %c0 = arith.constant 0 : index
    %c0_0 = arith.constant 0 : index
    %0 = vector.load %arg0[%c0, %c0_0] : memref<16x128xf32, #tpu.memory_space<vmem>>, vector<1x9xf32>
    %c1 = arith.constant 1 : index
    %c0_1 = arith.constant 0 : index
    %1 = vector.load %arg0[%c1, %c0_1] : memref<16x128xf32, #tpu.memory_space<vmem>>, vector<3x3xf32>
    %c4 = arith.constant 4 : index
    %c0_2 = arith.constant 0 : index
    %2 = vector.load %arg0[%c4, %c0_2] : memref<16x128xf32, #tpu.memory_space<vmem>>, vector<3x3xf32>
    %c7 = arith.constant 7 : index
    %c0_3 = arith.constant 0 : index
    %3 = vector.load %arg0[%c7, %c0_3] : memref<16x128xf32, #tpu.memory_space<vmem>>, vector<1x3xf32>
    %c8 = arith.constant 8 : index
    %c0_4 = arith.constant 0 : index
    %4 = vector.load %arg0[%c8, %c0_4] : memref<16x128xf32, #tpu.memory_space<vmem>>, vector<1x3xf32>
    %c9 = arith.constant 9 : index
    %c0_5 = arith.constant 0 : index
    %5 = vector.load %arg0[%c9, %c0_5] : memref<16x128xf32, #tpu.memory_space<vmem>>, vector<1x100xf32>
    %c10 = arith.constant 10 : index
    %c0_6 = arith.constant 0 : index
    %6 = vector.load %arg0[%c10, %c0_6] : memref<16x128xf32, #tpu.memory_space<vmem>>, vector<1x9xf32>
    %c11 = arith.constant 11 : index
    %c0_7 = arith.constant 0 : index
    %7 = vector.load %arg0[%c11, %c0_7] : memref<16x128xf32, #tpu.memory_space<vmem>>, vector<1x100xf32>
    %c12 = arith.constant 12 : index
    %c0_8 = arith.constant 0 : index
    %8 = vector.load %arg0[%c12, %c0_8] : memref<16x128xf32, #tpu.memory_space<vmem>>, vector<1x100xf32>
    %c13 = arith.constant 13 : index
    %c0_9 = arith.constant 0 : index
    %9 = vector.load %arg0[%c13, %c0_9] : memref<16x128xf32, #tpu.memory_space<vmem>>, vector<1x3xf32>
    %c0_10 = arith.constant 0 : index
    %c0_11 = arith.constant 0 : index
    %10 = vector.load %arg2[%c0_10, %c0_11] : memref<100x112xf32, #tpu.memory_space<vmem>>, vector<100x112xf32>
    %11 = vector.extract_strided_slice %0 {offsets = [0, 0], sizes = [1, 3], strides = [1, 1]} : vector<1x9xf32> to vector<1x3xf32>
    %c0_12 = arith.constant 0 : index
    %c0_13 = arith.constant 0 : index
    %c0_14 = arith.constant 0 : index
    %12 = vector.load %arg1[%c0_12, %c0_13, %c0_14] : memref<6x3x100xf32, #tpu.memory_space<vmem>>, vector<1x3x100xf32>
    %13 = vector.shape_cast %12 : vector<1x3x100xf32> to vector<3x100xf32>
    %cst = arith.constant dense<0.000000e+00> : vector<1x100xf32>
    %14 = tpu.matmul %11, %13, %cst {dimension_numbers = #tpu.dot_dimension_numbers<[1], [0], [0], [1], [0, 0, 1, 1], [], []>} : vector<1x3xf32>, vector<3x100xf32>, vector<1x100xf32> -> vector<1x100xf32>
    %15 = vector.extract_strided_slice %0 {offsets = [0, 3], sizes = [1, 3], strides = [1, 1]} : vector<1x9xf32> to vector<1x3xf32>
    %c1_15 = arith.constant 1 : index
    %c0_16 = arith.constant 0 : index
    %c0_17 = arith.constant 0 : index
    %16 = vector.load %arg1[%c1_15, %c0_16, %c0_17] : memref<6x3x100xf32, #tpu.memory_space<vmem>>, vector<1x3x100xf32>
    %17 = vector.shape_cast %16 : vector<1x3x100xf32> to vector<3x100xf32>
    %cst_18 = arith.constant dense<0.000000e+00> : vector<1x100xf32>
    %18 = tpu.matmul %15, %17, %cst_18 {dimension_numbers = #tpu.dot_dimension_numbers<[1], [0], [0], [1], [0, 0, 1, 1], [], []>} : vector<1x3xf32>, vector<3x100xf32>, vector<1x100xf32> -> vector<1x100xf32>
    %19 = arith.addf %14, %18 : vector<1x100xf32>
    %20 = vector.extract_strided_slice %0 {offsets = [0, 6], sizes = [1, 3], strides = [1, 1]} : vector<1x9xf32> to vector<1x3xf32>
    %c2 = arith.constant 2 : index
    %c0_19 = arith.constant 0 : index
    %c0_20 = arith.constant 0 : index
    %21 = vector.load %arg1[%c2, %c0_19, %c0_20] : memref<6x3x100xf32, #tpu.memory_space<vmem>>, vector<1x3x100xf32>
    %22 = vector.shape_cast %21 : vector<1x3x100xf32> to vector<3x100xf32>
    %cst_21 = arith.constant dense<0.000000e+00> : vector<1x100xf32>
    %23 = tpu.matmul %20, %22, %cst_21 {dimension_numbers = #tpu.dot_dimension_numbers<[1], [0], [0], [1], [0, 0, 1, 1], [], []>} : vector<1x3xf32>, vector<3x100xf32>, vector<1x100xf32> -> vector<1x100xf32>
    %24 = arith.addf %19, %23 : vector<1x100xf32>
    %25 = arith.addf %24, %5 : vector<1x100xf32>
    %cst_22 = arith.constant 0.000000e+00 : f32
    %26 = vector.broadcast %cst_22 : f32 to vector<1x100xf32>
    %27 = arith.maximumf %25, %26 : vector<1x100xf32>
    %cst_23 = arith.constant dense<0.000000e+00> : vector<1x112xf32>
    %28 = tpu.matmul %27, %10, %cst_23 {dimension_numbers = #tpu.dot_dimension_numbers<[1], [0], [0], [1], [0, 0, 1, 1], [], []>} : vector<1x100xf32>, vector<100x112xf32>, vector<1x112xf32> -> vector<1x112xf32>
    %29 = vector.extract_strided_slice %28 {offsets = [0, 100], sizes = [1, 9], strides = [1, 1]} : vector<1x112xf32> to vector<1x9xf32>
    %30 = arith.addf %29, %6 : vector<1x9xf32>
    %cst_24 = arith.constant 0.000000e+00 : f32
    %31 = vector.broadcast %cst_24 : f32 to vector<1x9xf32>
    %32 = arith.maximumf %30, %31 : vector<1x9xf32>
    %cst_25 = arith.constant dense<0.000000e+00> : vector<1x3xf32>
    %33 = tpu.matmul %4, %2, %cst_25 {dimension_numbers = #tpu.dot_dimension_numbers<[1], [0], [0], [1], [0, 0, 1, 1], [], []>} : vector<1x3xf32>, vector<3x3xf32>, vector<1x3xf32> -> vector<1x3xf32>
    %cst_26 = arith.constant 1.000000e+00 : f32
    %34 = vector.broadcast %cst_26 : f32 to vector<1x3xf32>
    %35 = arith.addf %33, %34 : vector<1x3xf32>
    %cst_27 = arith.constant dense<0.000000e+00> : vector<1x3xf32>
    %36 = tpu.matmul %3, %1, %cst_27 {dimension_numbers = #tpu.dot_dimension_numbers<[1], [0], [0], [1], [0, 0, 1, 1], [], []>} : vector<1x3xf32>, vector<3x3xf32>, vector<1x3xf32> -> vector<1x3xf32>
    %37 = vector.extract_strided_slice %3 {offsets = [0, 0], sizes = [1, 1], strides = [1, 1]} : vector<1x3xf32> to vector<1x1xf32>
    %38 = vector.extract_strided_slice %32 {offsets = [0, 0], sizes = [1, 3], strides = [1, 1]} : vector<1x9xf32> to vector<1x3xf32>
    %39 = vector.broadcast %37 : vector<1x1xf32> to vector<1x3xf32>
    %40 = arith.mulf %39, %38 : vector<1x3xf32>
    %41 = vector.extract_strided_slice %3 {offsets = [0, 1], sizes = [1, 1], strides = [1, 1]} : vector<1x3xf32> to vector<1x1xf32>
    %42 = vector.extract_strided_slice %32 {offsets = [0, 3], sizes = [1, 3], strides = [1, 1]} : vector<1x9xf32> to vector<1x3xf32>
    %43 = vector.broadcast %41 : vector<1x1xf32> to vector<1x3xf32>
    %44 = arith.mulf %43, %42 : vector<1x3xf32>
    %45 = arith.addf %40, %44 : vector<1x3xf32>
    %46 = vector.extract_strided_slice %3 {offsets = [0, 2], sizes = [1, 1], strides = [1, 1]} : vector<1x3xf32> to vector<1x1xf32>
    %47 = vector.extract_strided_slice %32 {offsets = [0, 6], sizes = [1, 3], strides = [1, 1]} : vector<1x9xf32> to vector<1x3xf32>
    %48 = vector.broadcast %46 : vector<1x1xf32> to vector<1x3xf32>
    %49 = arith.mulf %48, %47 : vector<1x3xf32>
    %50 = arith.addf %45, %49 : vector<1x3xf32>
    %c3 = arith.constant 3 : index
    %c0_28 = arith.constant 0 : index
    %c0_29 = arith.constant 0 : index
    %51 = vector.load %arg1[%c3, %c0_28, %c0_29] : memref<6x3x100xf32, #tpu.memory_space<vmem>>, vector<1x3x100xf32>
    %52 = vector.shape_cast %51 : vector<1x3x100xf32> to vector<3x100xf32>
    %cst_30 = arith.constant dense<0.000000e+00> : vector<1x100xf32>
    %53 = tpu.matmul %35, %52, %cst_30 {dimension_numbers = #tpu.dot_dimension_numbers<[1], [0], [0], [1], [0, 0, 1, 1], [], []>} : vector<1x3xf32>, vector<3x100xf32>, vector<1x100xf32> -> vector<1x100xf32>
    %c4_31 = arith.constant 4 : index
    %c0_32 = arith.constant 0 : index
    %c0_33 = arith.constant 0 : index
    %54 = vector.load %arg1[%c4_31, %c0_32, %c0_33] : memref<6x3x100xf32, #tpu.memory_space<vmem>>, vector<1x3x100xf32>
    %55 = vector.shape_cast %54 : vector<1x3x100xf32> to vector<3x100xf32>
    %cst_34 = arith.constant dense<0.000000e+00> : vector<1x100xf32>
    %56 = tpu.matmul %36, %55, %cst_34 {dimension_numbers = #tpu.dot_dimension_numbers<[1], [0], [0], [1], [0, 0, 1, 1], [], []>} : vector<1x3xf32>, vector<3x100xf32>, vector<1x100xf32> -> vector<1x100xf32>
    %57 = arith.addf %53, %56 : vector<1x100xf32>
    %c5 = arith.constant 5 : index
    %c0_35 = arith.constant 0 : index
    %c0_36 = arith.constant 0 : index
    %58 = vector.load %arg1[%c5, %c0_35, %c0_36] : memref<6x3x100xf32, #tpu.memory_space<vmem>>, vector<1x3x100xf32>
    %59 = vector.shape_cast %58 : vector<1x3x100xf32> to vector<3x100xf32>
    %cst_37 = arith.constant dense<0.000000e+00> : vector<1x100xf32>
    %60 = tpu.matmul %50, %59, %cst_37 {dimension_numbers = #tpu.dot_dimension_numbers<[1], [0], [0], [1], [0, 0, 1, 1], [], []>} : vector<1x3xf32>, vector<3x100xf32>, vector<1x100xf32> -> vector<1x100xf32>
    %61 = arith.addf %57, %60 : vector<1x100xf32>
    %62 = arith.addf %61, %7 : vector<1x100xf32>
    %cst_38 = arith.constant dense<0.000000e+00> : vector<1x112xf32>
    %63 = tpu.matmul %62, %10, %cst_38 {dimension_numbers = #tpu.dot_dimension_numbers<[1], [0], [0], [1], [0, 0, 1, 1], [], []>} : vector<1x100xf32>, vector<100x112xf32>, vector<1x112xf32> -> vector<1x112xf32>
    %64 = vector.extract_strided_slice %63 {offsets = [0, 0], sizes = [1, 100], strides = [1, 1]} : vector<1x112xf32> to vector<1x100xf32>
    %65 = arith.addf %64, %8 : vector<1x100xf32>
    %cst_39 = arith.constant dense<0.000000e+00> : vector<1x112xf32>
    %66 = tpu.matmul %65, %10, %cst_39 {dimension_numbers = #tpu.dot_dimension_numbers<[1], [0], [0], [1], [0, 0, 1, 1], [], []>} : vector<1x100xf32>, vector<100x112xf32>, vector<1x112xf32> -> vector<1x112xf32>
    %67 = vector.extract_strided_slice %66 {offsets = [0, 109], sizes = [1, 3], strides = [1, 1]} : vector<1x112xf32> to vector<1x3xf32>
    %68 = arith.addf %67, %9 : vector<1x3xf32>
    %c0_40 = arith.constant 0 : index
    %c0_41 = arith.constant 0 : index
    %69 = vector.load %arg3[%c0_40, %c0_41] : memref<1x3xf32, #tpu.memory_space<vmem>>, vector<1x3xf32>
    tpu.vector_store %arg3[%c0_40, %c0_41], %68 {strides = array<i32>} : memref<1x3xf32, #tpu.memory_space<vmem>>, vector<1x3xf32>,
    return
  }
}

</mosaic_0001>

<bundles_post_ra>
// kernel: cvxnn_forward.1
= control target key start
LH: loop header
LB: loop body
LE: loop exit
PB: predicated region body
PF: predicated region fallthrough
CT: control target
= control target key end

     0   :  { %vm47_vm0 = vcmask 1042432   ;;  %s1256_s14 = smov 125   ;;  %v1257_v1 = vmov 0.0   ;;  %vm44_vm1 = vcmask 23552   ;;  %vm1258_vm2 = vmmov 0   ;;  %s1259_s27 = smov 122   ;;  %s1500_s0 = inlined_call_operand.vmem [shape: f32[16,128], index: 0, kind: input, shape index: {}]   ;;  %s1501_s1 = inlined_call_operand.vmem [shape: f32[6,3,100], index: 1, kind: input, shape index: {}]   ;;  %s1502_s2 = inlined_call_operand.vmem [shape: f32[100,112], index: 2, kind: input, shape index: {}]   ;;  %s1503_s3 = inlined_call_operand.hbm [shape: f32[1,3], index: 3, kind: output, shape index: {}]  }
   0x1   :  { %v15_v0 = vld [vmem:[%s1500_s0] sm:$0x1]  ;;  %1034 = vmatprep.subr.mxu0 %v1257_v1  ;;  %v949_v2 = vld [vmem:[%s1501_s1 + $0x4] sm:$0x7]  ;;  %1039 = vmatprep.subr.mxu1 %v1257_v1  ;;  %v26_v5 = vld [vmem:[%s1502_s2 + $0x8] sm:$0xff] }
   0x2   :  { %42 = vrot.lane.b32.xlu0 %v15_v0, %s1256_s14  ;;  %v38_v3 = vld [vmem:[%s1501_s1] sm:$0x7]  ;;  %1035 = vmatpush3.msk.msra.mxu0 %vm47_vm0, %v949_v2  ;;  %v27_v7 = vld [vmem:[%s1502_s2 + $0x10] sm:$0xff]  ;;  %v28_v8 = vld [vmem:[%s1502_s2 + $0x18] sm:$0xff] }
   0x3   :  { %v25_v4 = vld [vmem:[%s1502_s2] sm:$0xff]  ;;  %1036 = vmatprep.mubr.msk.f32.mxu0 %vm1258_vm2, %v1257_v1  ;;  %1040 = vmatpush3.msk.msra.mxu1 %vm47_vm0, %v38_v3 }
   0x4   :  { %v1311_v6 = vpack.c.bf16 %v26_v5, %v25_v4  ;;  %1041 = vmatprep.mubr.msk.f32.mxu1 %vm1258_vm2, %v1257_v1  ;;  %1044 = vmatprep.subr.mxu0 %v1257_v1 }
   0x5   :  { %1042 = vmatmul.mubr.msk.f32.vlgmr.msra.gmra.mrb[0].mxu1 %vm44_vm1, %v15_v0 }
   0x6   :  { %198 = vrot.lane.b32.xlu0 %v15_v0, %s1259_s27 }
   0x7   :  { %8 = vsyncpa [#allocation3], 0  ;;  %v1260_v9 = vmov 0.0|0.0   ;;  %1075 = vmatprep.mubr.msk.f32.mxu1 %vm1258_vm2, %v1257_v1  ;;  %v1328_v10 = vpack.c.bf16 %v28_v8, %v27_v7  ;;  %v29_v11 = vld [vmem:[%s1502_s2 + $0x20] sm:$0xff]  ;;  %v30_v12 = vld [vmem:[%s1502_s2 + $0x28] sm:$0xff]  ;;  %vm282_vm3 = vcmask 1043456  }
   0x8   :  { %1161 = vmatprep.subr.bf16.mxu1 %v1260_v9  ;;  %v1338_v13 = vpack.c.bf16 %v30_v12, %v29_v11  ;;  %v31_v14 = vld [vmem:[%s1502_s2 + $0x30] sm:$0xff]  ;;  %v32_v15 = vld [vmem:[%s1502_s2 + $0x38] sm:$0xff]  ;;  %v954_v17 = vld [vmem:[%s1501_s1 + $0x8] sm:$0x7]  ;;  %v1261_v28 = vmov 1   ;;  %v1262_v30 = vmov 2  }
   0x9   :  { %1163 = vmatpush3.bf16.msra.mxu1 %v1311_v6  ;;  %v1348_v16 = vpack.c.bf16 %v32_v15, %v31_v14  ;;  %v33_v20 = vld [vmem:[%s1502_s2 + $0x40] sm:$0xff]  ;;  %v34_v21 = vld [vmem:[%s1502_s2 + $0x48] sm:$0xff]  ;;  %v35_v23 = vld [vmem:[%s1502_s2 + $0x50] sm:$0xff]  ;;  %1228 = vset.pattern.permute.xlu1 %v1261_v28  ;;  %v1264_v33 = vmov 0   ;;  %vm278_vm4 = vcmask 818176   ;;  %s1265_s12 = smov 28  }
   0xa   :  { %1164 = vmatprep.subr.bf16.mxu1 %v1260_v9  ;;  %v1370_v22 = vpack.c.bf16 %v34_v21, %v33_v20  ;;  %v36_v24 = vld [vmem:[%s1502_s2 + $0x58] sm:$0xff]  ;;  %v1387_v26 = vld [vmem:[%s1502_s2 + $0x60] sm:$0xf]  ;;  %v18_v27 = vld [vmem:[%s1500_s0 + $0x7] sm:$0x1]  ;;  %1231 = vset.pattern.permute.xlu0 %v1262_v30  ;;  %s1263_s2 = smov 100  }
   0xb   :  { %v1380_v25 = vpack.c.bf16 %v36_v24, %v35_v23  ;;  %v21_v29 = vld [vmem:[%s1500_s0 + $0xa] sm:$0x1]  ;;  %520 = vperm.xlu1 %1228, %v18_v27   ;;  %v20_v37 = vld [vmem:[%s1500_s0 + $0x9] sm:$0x1]  ;;  %v17_v43 = vld [vmem:[%s1500_s0 + $0x4] sm:$0x7] }
   0xc   :  { %357 = vrot.lane.b32.xlu0 %v21_v29, %s1263_s2  ;;  %v19_v44 = vld [vmem:[%s1500_s0 + $0x8] sm:$0x1]  ;;  %v16_v45 = vld [vmem:[%s1500_s0 + $0x1] sm:$0x7]  ;;  %v964_v48 = vld [vmem:[%s1501_s1 + $0x10] sm:$0x7] }
   0xd   :  { %1166 = vmatpush3.bf16.msra.mxu1 %v1328_v10  ;;  %v963_v58 = vld [vmem:[%s1501_s1 + $0xc] sm:$0x7]  ;;  %v969_v62 = vld [vmem:[%s1501_s1 + $0x14] sm:$0x7]  ;;  %s1266_s17 = smov 109   ;;  %s1267_s20 = smov 19  }
   0xe   :  { %1167 = vmatprep.subr.bf16.mxu1 %v1260_v9  ;;  %s1268_s21 = smov [#allocation2]   ;;  %vm933_vm5 = vcmask 16384  }
   0xf   :  { %1229 = vset.pattern.permute.xlu1 %v1262_v30  ;;  %s941_s22 = sshll.u32 %s1268_s21, 4  ;;  %s942_s22 = int_to_ptr.vmem [resolvable:$true] %s941_s22 }
  0x10   :  { %530 = vperm.xlu1 %1229, %v18_v27   ;;  %s1232_s23 = scalar_lea.vmem %s942_s22, 16  ;;  %p1237_p1 = scmp.lt.s32.totalorder %s942_s22, %s942_s22 }
  0x11   :  { %1169 = vmatpush3.bf16.msra.mxu1 %v1338_v13  ;;  %p1233_p0 = scmp.ne.s32.totalorder %s942_s22, %s1232_s23 }
  0x12   :  { %1170 = vmatprep.subr.bf16.mxu1 %v1260_v9 }
  0x14   :  { %1230 = vset.pattern.permute.xlu1 %v1264_v33 }
  0x15   :  { %1172 = vmatpush3.bf16.msra.mxu1 %v1348_v16  ;;  %515 = vperm.xlu1 %1230, %v18_v27  }
  0x16   :  { %1173 = vmatprep.subr.bf16.mxu1 %v1260_v9 }
  0x19   :  { %1175 = vmatpush3.bf16.msra.mxu1 %v1370_v22 }
  0x1a   :  { %1176 = vmatprep.subr.bf16.mxu1 %v1260_v9 }
  0x1d   :  { %1178 = vmatpush3.bf16.msra.mxu1 %v1380_v25 }
  0x1e   :  { %1073 = vmatprep.subr.mxu1 %v1257_v1 }
  0x21   :  { %1074 = vmatpush3.msk.msra.mxu1 %vm282_vm3, %v1387_v26 }
  0x22   :  { %1197 = vmatprep.subr.bf16.mxu1 %v1260_v9 }
  0x74   :  { %v43_v18 = vpop.permute.xlu0 %42 }
  0x75   :  { %1037 = vmatmul.mubr.msk.f32.vlgmr.msra.gmra.mrb[0].mxu0 %vm44_vm1, %v43_v18 }
  0x76   :  { %1045 = vmatpush3.msk.msra.mxu0 %vm47_vm0, %v954_v17  ;;  %1046 = vmatprep.mubr.msk.f32.mxu0 %vm1258_vm2, %v1257_v1  ;;  %v23_v17 = vld [vmem:[%s1500_s0 + $0xc] sm:$0x1] }
  0x77   :  { %1078 = vmatprep.subr.mxu0 %v1257_v1 }
  0x78   :  { %v199_v19 = vpop.permute.xlu0 %198 }
  0x79   :  { %1047 = vmatmul.mubr.msk.f32.vlgmr.msra.gmra.mrb[2].mxu0 %vm44_vm1, %v199_v19 }
  0x7a   :  { %1080 = vmatprep.mubr.msk.f32.mxu0 %vm1258_vm2, %v1257_v1  ;;  %1079 = vmatpush3.msk.msra.mxu0 %vm47_vm0, %v17_v43 }
  0x7b   :  { %1083 = vmatprep.subr.mxu0 %v1257_v1 }
  0x7d   :  { %1081 = vmatmul.mubr.msk.f32.vlgmr.msra.gmra.mrb[4].mxu0 %vm44_vm1, %v19_v44 }
  0x7e   :  { %1084 = vmatpush3.msk.msra.mxu0 %vm47_vm0, %v16_v45  ;;  %1085 = vmatprep.mubr.msk.f32.mxu0 %vm1258_vm2, %v1257_v1  ;;  %v358_v47 = vpop.permute.xlu0 %357 }
  0x7f   :  { %1088 = vmatprep.subr.mxu0 %v1257_v1 }
  0x81   :  { %1086 = vmatmul.mubr.msk.f32.vlgmr.msra.gmra.mrb[6].mxu0 %vm44_vm1, %v18_v27 }
  0x82   :  { %1090 = vmatprep.mubr.msk.f32.mxu0 %vm1258_vm2, %v1257_v1  ;;  %1089 = vmatpush3.msk.msra.mxu0 %vm47_vm0, %v964_v48 }
  0x83   :  { %1093 = vmatprep.subr.mxu0 %v1257_v1 }
  0x8a   :  { %v521_v46 = vpop.permute.xlu1 %520 }
  0x8f   :  { %v531_v53 = vpop.permute.xlu1 %530 }
  0x94   :  { %v516_v63 = vpop.permute.xlu1 %515 }
  0xd8   :  { %v192_v31 = vpop.f32.mrb[0].mxu1 }
  0xd9   :  { %v1043_v32 = vpop.f32.mrb[1].mxu1 }
 0x148   :  { %v117_v34 = vpop.f32.mrb[0].mxu0 }
 0x149   :  { %v193_v35 = vadd.f32 %v192_v31, %v117_v34  ;;  %v1038_v36 = vpop.f32.mrb[1].mxu0 }
 0x14c   :  { %v271_v38 = vpop.f32.mrb[2].mxu0 }
 0x14d   :  { %v275_v39 = vadd.f32 %v271_v38, %v193_v35  ;;  %v1048_v40 = vpop.f32.mrb[3].mxu0 }
 0x14f   :  { %v276_v41 = vadd.f32 %v275_v39, %v20_v37 }
 0x150   :  { %v434_v56 = vpop.f32.mrb[4].mxu0 }
 0x151   :  { %v277_v42 = vmax.f32 %v276_v41, 0.0  ;;  %v1082_v57 = vpop.f32.mrb[5].mxu0  ;;  %v435_v60 = vadd.f32 1.0, %v434_v56 }
 0x153   :  { %1076 = vmatmul.mubr.msk.f32.vlgmr.msra.gmra.mrb[2].mxu1 %vm278_vm4, %v277_v42 }
 0x154   :  { %1199 = vmatpush3.bf16.msra.mxu1 %v1311_v6  ;;  %1158 = vmatprep.mubr.msk.f32.mxu1 %vm1258_vm2, %v1257_v1  ;;  %v510_v59 = vpop.f32.mrb[6].mxu0 }
 0x155   :  { %1200 = vmatprep.subr.bf16.mxu1 %v1260_v9  ;;  %1091 = vmatmul.mubr.msk.f32.vlgmr.msra.gmra.mrb[8].mxu0 %vm44_vm1, %v510_v59  ;;  %v1087_v61 = vpop.f32.mrb[7].mxu0 }
 0x156   :  { %1094 = vmatpush3.msk.msra.mxu0 %vm47_vm0, %v963_v58  ;;  %1095 = vmatprep.mubr.msk.f32.mxu0 %vm1258_vm2, %v1257_v1 }
 0x157   :  { %1098 = vmatprep.subr.mxu0 %v1257_v1 }
 0x158   :  { %1202 = vmatpush3.bf16.msra.mxu1 %v1328_v10 }
 0x159   :  { %1203 = vmatprep.subr.bf16.mxu1 %v1260_v9  ;;  %1096 = vmatmul.mubr.msk.f32.vlgmr.msra.gmra.mrb[10].mxu0 %vm44_vm1, %v435_v60 }
 0x15a   :  { %1099 = vmatpush3.msk.msra.mxu0 %vm47_vm0, %v969_v62  ;;  %1100 = vmatprep.mubr.msk.f32.mxu0 %vm1258_vm2, %v1257_v1 }
 0x15b   :  { %1179 = vmatprep.subr.bf16.mxu0 %v1260_v9 }
 0x15c   :  { %1205 = vmatpush3.bf16.msra.mxu1 %v1338_v13 }
 0x15d   :  { %1206 = vmatprep.subr.bf16.mxu1 %v1260_v9 }
 0x160   :  { %1208 = vmatpush3.bf16.msra.mxu1 %v1348_v16 }
 0x161   :  { %1209 = vmatprep.subr.bf16.mxu1 %v1260_v9 }
 0x164   :  { %1211 = vmatpush3.bf16.msra.mxu1 %v1370_v22 }
 0x165   :  { %1212 = vmatprep.subr.bf16.mxu1 %v1260_v9 }
 0x168   :  { %1214 = vmatpush3.bf16.msra.mxu1 %v1380_v25 }
 0x169   :  { %1156 = vmatprep.subr.mxu1 %v1257_v1 }
 0x16c   :  { %1157 = vmatpush3.msk.msra.mxu1 %vm282_vm3, %v1387_v26 }
 0x226   :  { %v352_v49 = vpop.f32.mrb[2].mxu1 }
 0x227   :  { %v360_v50 = vadd.f32 %v358_v47, %v352_v49  ;;  %v1077_v51 = vpop.f32.mrb[3].mxu1 }
 0x229   :  { %v361_v52 = vmax.f32 %v360_v50, 0.0 }
 0x22b   :  { %v533_v54 = vmul.f32 %v531_v53, %v361_v52  ;;  %v523_v55 = vmul.f32 %v521_v46, %v361_v52  ;;  %v518_v0 = vmul.f32 %v516_v63, %v361_v52 }
 0x22d   :  { %535 = vrot.lane.b32.xlu1 %v533_v54, %s1259_s27  ;;  %525 = vrot.lane.b32.xlu0 %v523_v55, %s1256_s14 }
 0x29f   :  { %v526_v2 = vpop.permute.xlu0 %525  ;;  %v536_v4 = vpop.permute.xlu1 %535 }
 0x2a0   :  { %v528_v3 = vadd.f32 %v526_v2, %v518_v0 }
 0x2a2   :  { %v538_v5 = vadd.f32 %v536_v4, %v528_v3 }
 0x2a4   :  { %698 = vrot.lane.b32.xlu0 %v538_v5, %s1265_s12 }
 0x316   :  { %v699_v7 = vpop.permute.xlu0 %698 }
 0x317   :  { %1101 = vmatmul.mubr.msk.f32.vlgmr.msra.gmra.mrb[12].mxu0 %vm44_vm1, %v699_v7 }
 0x318   :  { %1181 = vmatpush3.bf16.msra.mxu0 %v1311_v6  ;;  %1129 = vmatprep.mubr.msk.f32.mxu0 %vm1258_vm2, %v1257_v1  ;;  %v615_v6 = vpop.f32.mrb[8].mxu0 }
 0x319   :  { %1182 = vmatprep.subr.bf16.mxu0 %v1260_v9  ;;  %v1092_v8 = vpop.f32.mrb[9].mxu0 }
 0x31c   :  { %1184 = vmatpush3.bf16.msra.mxu0 %v1328_v10  ;;  %v691_v10 = vpop.f32.mrb[10].mxu0 }
 0x31d   :  { %1185 = vmatprep.subr.bf16.mxu0 %v1260_v9  ;;  %v692_v11 = vadd.f32 %v691_v10, %v615_v6  ;;  %v1097_v12 = vpop.f32.mrb[11].mxu0 }
 0x320   :  { %1187 = vmatpush3.bf16.msra.mxu0 %v1338_v13  ;;  %v22_v13 = vld [vmem:[%s1500_s0 + $0xb] sm:$0x1] }
 0x321   :  { %1188 = vmatprep.subr.bf16.mxu0 %v1260_v9 }
 0x324   :  { %1190 = vmatpush3.bf16.msra.mxu0 %v1348_v16 }
 0x325   :  { %1191 = vmatprep.subr.bf16.mxu0 %v1260_v9 }
 0x328   :  { %1193 = vmatpush3.bf16.msra.mxu0 %v1370_v22 }
 0x329   :  { %1194 = vmatprep.subr.bf16.mxu0 %v1260_v9 }
 0x32c   :  { %1196 = vmatpush3.bf16.msra.mxu0 %v1380_v25 }
 0x32d   :  { %1127 = vmatprep.subr.mxu0 %v1257_v1  ;;  %v24_v1 = vld [vmem:[%s1500_s0 + $0xd] sm:$0x1]  ;;  %s1236_s0 = scalar_lea.vmem %s942_s22, 32 }
 0x32e   :  { %925 = vrot.lane.b32.xlu1 %v24_v1, %s1266_s17  ;;  %p1238_p2 = scmp.lt.s32.totalorder %s1236_s0, %s1232_s23 }
 0x330   :  { %1128 = vmatpush3.msk.msra.mxu0 %vm282_vm3, %v1387_v26  ;;  %p1239_p3 = por %p1238_p2, %p1237_p1 }
 0x332   :  { %p1240_p4 = pnand %p1239_p3, %p1233_p0 }
 0x3a0   :  { %v926_v21 = vpop.permute.xlu1 %925 }
 0x3ea   :  { %v771_v14 = vpop.f32.mrb[12].mxu0 }
 0x3eb   :  { %v775_v15 = vadd.f32 %v771_v14, %v692_v11  ;;  %v1102_v16 = vpop.f32.mrb[13].mxu0 }
 0x3ed   :  { %v776_v9 = vadd.f32 %v775_v15, %v22_v13 }
 0x3ef   :  { %1130 = vmatmul.mubr.msk.f32.vlgmr.msra.gmra.mrb[14].mxu0 %vm278_vm4, %v776_v9 }
 0x4c2   :  { %v846_v18 = vpop.f32.mrb[14].mxu0 }
 0x4c3   :  { %v850_v19 = vadd.f32 %v846_v18, %v23_v17  ;;  %v1131_v20 = vpop.f32.mrb[15].mxu0 }
 0x4c5   :  { %1159 = vmatmul.mubr.msk.f32.vlgmr.msra.gmra.mrb[4].mxu1 %vm278_vm4, %v850_v19 }
 0x598   :  { %v920_v22 = vpop.f32.mrb[4].mxu1 }
 0x599   :  { %v928_v23 = vadd.f32 %v926_v21, %v920_v22  ;;  %v1160_v24 = vpop.f32.mrb[5].mxu1 }
 0x59b   :  { %930 = vrot.lane.b32.xlu0 %v928_v23, %s1267_s20 }
 0x60d   :  { %v931_v25 = vpop.permute.xlu0 %930 }
 0x60e   :  { %934 = vst.msk [vmem:[#allocation2] sm:$0x1] %vm933_vm5, %v931_v25 }
 0x60f   :  { %1243 = shalt.err (!%p1240_p4)
}
 0x610   :  { %s1244_s2 = scalar_lea.hbm %s1503_s3, 16 }
 0x611   :  { %p1245_p5 = scmp.ne.s32.totalorder %s1503_s3, %s1244_s2  ;;  %p1248_p6 = scmp.lt.u32.totalorder %s1244_s2, %s1503_s3 }
 0x613   :  { %p1250_p7 = pnand %p1248_p6, %p1245_p5 }
 0x615   :  { %1253 = shalt.err (!%p1250_p7)
}
 0x616   :  { %944 = dma.vmem_to_hbm [thread:$0]  %s942_s22, 16, %s1503_s3, [#allocation3]  }
 0x617   :  { %1254 = dma.done.wait [#allocation3], 16  }
 0x618   :  { %1255 = vsyncadd [#allocation3], 4294967280 }
 0x619   :  { %948 = vsyncpa [#allocation3], 1 }

</bundles_post_ra>
